<compile_context>
chip_gen: v5e
topology: v5e:2x2
jax: 0.10.0
libtpu: 0.0.40
codegen_flags: <defaults>
</compile_context>

<pallas_src>
import functools
import numpy as np
import jax
import jax.numpy as jnp
from jax.experimental import pallas as pl
from jax.experimental.pallas import tpu as pltpu


def get_slices(dim, head_id):
    """Same slicing logic as the PyTorch reference (static, host side)."""
    if head_id == 0:
        return [(0, dim)]
    offset = dim // 2 ** (head_id + 1)
    starts = np.arange(0, dim, offset)
    slices1 = [(int(x), int(x + offset)) for i, x in enumerate(starts) if i % 2 == 0]
    slices2 = [(int(x), int(x + offset)) for i, x in enumerate(starts) if i % 2 == 1]
    return slices1 + slices2


def _round_up(v, m):
    return (v + m - 1) // m * m


def _query_kernel(x_ref, o_ref, *, heads, shuffle, slices, input_dim):
    # x_ref: (tm, dim)   o_ref: (tm, heads*dim)  -- lane-dense output slab
    x = x_ref[...]
    tm = x.shape[0]

    if not shuffle:
        # all heads identical: build the full slab, one wide unmasked store
        out = jnp.concatenate([x] * heads, axis=-1)
    else:
        head_outs = []
        for h in range(heads):
            if h == 0:
                head_outs.append(x)
            else:
                offset = input_dim // (2 ** (h + 1))
                if offset % 128 == 0:
                    # even/odd block de-interleave == transpose of non-minor
                    # axes (lane-aligned, no sub-vreg slicing / lane permutes)
                    n = 2 ** h
                    y = x.reshape(tm, n, 2, offset)
                    y = jnp.swapaxes(y, 1, 2)          # (tm, 2, n, offset)
                    head_outs.append(y.reshape(tm, input_dim))
                else:
                    # small-offset fallback: static slices + concat
                    parts = [x[:, a:b] for (a, b) in slices[h]]
                    head_outs.append(jnp.concatenate(parts, axis=-1))
        out = jnp.concatenate(head_outs, axis=-1)

    o_ref[...] = out


def query_identity(x, input_dim, heads, shuffle_hidden):
    """JAX/Pallas equivalent of QueryIdentity.forward."""
    assert x.shape[-1] == input_dim
    assert (shuffle_hidden is False) or heads > 1
    assert (shuffle_hidden is False) or (input_dim % 2 ** heads == 0)

    x2 = x.reshape(-1, input_dim) if x.ndim > 2 else x
    bs = x2.shape[0]

    if heads == 1:
        # PyTorch returns the (flattened) input unchanged; no copy needed.
        return x2

    slices = (
        {h: get_slices(input_dim, h) for h in range(heads)} if shuffle_hidden else None
    )

    itemsize = jnp.dtype(x2.dtype).itemsize
    # sublane packing: 8 rows/vreg for 32-bit, 16 for bf16, 32 for int8/fp8
    packing = 8 * max(1, 4 // itemsize)

    # Size the row tile against a VMEM budget that is safe on v5e/v6e (128 MiB
    # physical) and v7x (64 MiB physical): double-buffered in+out tiles
    # <= ~40 MiB, capped at 512 rows (mem-bound copies are ~85-90% of roofline
    # at 512; beyond that returns diminish).
    vmem_budget = 40 * 1024 * 1024
    bytes_per_row_db = 2 * (1 + heads) * input_dim * itemsize  # double-buffered
    tm_cap = max(packing, (vmem_budget // bytes_per_row_db) // packing * packing)
    tm_cap = min(tm_cap, 512)
    tm = min(tm_cap, _round_up(bs, packing))

    grid = (pl.cdiv(bs, tm),)  # partial tail block handled by Pallas masking

    kernel = functools.partial(
        _query_kernel,
        heads=heads,
        shuffle=bool(shuffle_hidden),
        slices=slices,
        input_dim=input_dim,
    )

    out = pl.pallas_call(
        kernel,
        out_shape=jax.ShapeDtypeStruct((bs, heads * input_dim), x2.dtype),
        grid_spec=pltpu.PrefetchScalarGridSpec(
            num_scalar_prefetch=0,
            grid=grid,
            in_specs=[pl.BlockSpec((tm, input_dim), lambda i: (i, 0))],
            out_specs=pl.BlockSpec((tm, heads * input_dim), lambda i: (i, 0)),
        ),
        compiler_params=pltpu.CompilerParams(
            dimension_semantics=("parallel",),
            vmem_limit_bytes=48 * 1024 * 1024,
        ),
        cost_estimate=pl.CostEstimate(
            flops=0,
            transcendentals=0,
            bytes_accessed=(1 + heads) * bs * input_dim * itemsize,
        ),
    )(x2)

    # contiguous reshape (metadata only): (bs, heads*dim) -> (bs*heads, dim)
    return out.reshape(bs * heads, input_dim)


def _reference(x, input_dim, heads, shuffle_hidden):
    """Pure-numpy reference mirroring the PyTorch forward (for verification)."""
    x2 = np.asarray(x).reshape(-1, input_dim)
    bs = x2.shape[0]
    if heads == 1:
        return x2
    if not shuffle_hidden:
        return np.repeat(x2[:, None, :], heads, axis=1).reshape(bs * heads, input_dim)
    slices = {h: get_slices(input_dim, h) for h in range(heads)}
    cat = np.concatenate(
        [x2[:, a:b] for h in range(heads) for (a, b) in slices[h]], axis=1
    )
    return cat.reshape(bs * heads, input_dim)


if __name__ == "__main__":
    key = jax.random.PRNGKey(0)

    # 1) shuffled-queries path (small offsets -> slice/concat fallback)
    input_dim, heads, shuffle_hidden = 32, 3, True
    x = jax.random.normal(key, (2, 8, input_dim), dtype=jnp.float32)
    out = jax.block_until_ready(query_identity(x, input_dim, heads, shuffle_hidden))
    ref = _reference(np.asarray(x), input_dim, heads, shuffle_hidden)
    assert out.shape == (2 * 8 * heads, input_dim), out.shape
    np.testing.assert_allclose(np.asarray(out), ref, rtol=0, atol=0)

    # 2) repeat (non-shuffle) path
    out2 = jax.block_until_ready(query_identity(x, input_dim, 2, False))
    np.testing.assert_allclose(np.asarray(out2), _reference(np.asarray(x), input_dim, 2, False))

    # 3) bs not a multiple of the row tile (exercises masked tail block, no pad)
    x3 = jax.random.normal(jax.random.PRNGKey(1), (3, 5, input_dim), dtype=jnp.float32)
    out3 = jax.block_until_ready(query_identity(x3, input_dim, 3, True))
    np.testing.assert_allclose(np.asarray(out3), _reference(np.asarray(x3), input_dim, 3, True))

    # 4) lane-aligned shuffle path (offset >= 128 -> transpose, no slicing)
    dim4 = 512
    x4 = jax.random.normal(jax.random.PRNGKey(2), (2, 4, dim4), dtype=jnp.float32)
    out4 = jax.block_until_ready(query_identity(x4, dim4, 2, True))
    np.testing.assert_allclose(np.asarray(out4), _reference(np.asarray(x4), dim4, 2, True))

    print("KERNEL_OK")
</pallas_src>

<mosaic_0001>
module attributes {stable_mosaic.version = 11 : i64} {
  func.func @_query_kernel(%arg0: i32, %arg1: memref<16x32xf32, #tpu.memory_space<vmem>>, %arg2: memref<16x96xf32, #tpu.memory_space<vmem>>) attributes {dimension_semantics = [#tpu.dimension_semantics<parallel>], iteration_bounds = array<i64: 1>, scalar_prefetch = 0 : i64, scratch_operands = 0 : i64, tpu.core_type = #tpu.core_type<tc>, window_params = [{transform_indices = @transform_0, window_bounds = array<i64: 16, 32>}, {transform_indices = @transform_1, window_bounds = array<i64: 16, 96>}]} {
    %c0 = arith.constant 0 : index
    %c0_0 = arith.constant 0 : index
    %0 = vector.load %arg1[%c0, %c0_0] : memref<16x32xf32, #tpu.memory_space<vmem>>, vector<16x32xf32>
    %1 = vector.extract_strided_slice %0 {offsets = [0, 0], sizes = [16, 8], strides = [1, 1]} : vector<16x32xf32> to vector<16x8xf32>
    %2 = vector.extract_strided_slice %0 {offsets = [0, 16], sizes = [16, 8], strides = [1, 1]} : vector<16x32xf32> to vector<16x8xf32>
    %3 = vector.extract_strided_slice %0 {offsets = [0, 8], sizes = [16, 8], strides = [1, 1]} : vector<16x32xf32> to vector<16x8xf32>
    %4 = vector.extract_strided_slice %0 {offsets = [0, 24], sizes = [16, 8], strides = [1, 1]} : vector<16x32xf32> to vector<16x8xf32>
    %5 = tpu.concatenate %1, %2, %3, %4 in 1 : vector<16x8xf32>, vector<16x8xf32>, vector<16x8xf32>, vector<16x8xf32> -> vector<16x32xf32>
    %6 = vector.extract_strided_slice %0 {offsets = [0, 0], sizes = [16, 4], strides = [1, 1]} : vector<16x32xf32> to vector<16x4xf32>
    %7 = vector.extract_strided_slice %0 {offsets = [0, 8], sizes = [16, 4], strides = [1, 1]} : vector<16x32xf32> to vector<16x4xf32>
    %8 = vector.extract_strided_slice %0 {offsets = [0, 16], sizes = [16, 4], strides = [1, 1]} : vector<16x32xf32> to vector<16x4xf32>
    %9 = vector.extract_strided_slice %0 {offsets = [0, 24], sizes = [16, 4], strides = [1, 1]} : vector<16x32xf32> to vector<16x4xf32>
    %10 = vector.extract_strided_slice %0 {offsets = [0, 4], sizes = [16, 4], strides = [1, 1]} : vector<16x32xf32> to vector<16x4xf32>
    %11 = vector.extract_strided_slice %0 {offsets = [0, 12], sizes = [16, 4], strides = [1, 1]} : vector<16x32xf32> to vector<16x4xf32>
    %12 = vector.extract_strided_slice %0 {offsets = [0, 20], sizes = [16, 4], strides = [1, 1]} : vector<16x32xf32> to vector<16x4xf32>
    %13 = vector.extract_strided_slice %0 {offsets = [0, 28], sizes = [16, 4], strides = [1, 1]} : vector<16x32xf32> to vector<16x4xf32>
    %14 = tpu.concatenate %6, %7, %8, %9, %10, %11, %12, %13 in 1 : vector<16x4xf32>, vector<16x4xf32>, vector<16x4xf32>, vector<16x4xf32>, vector<16x4xf32>, vector<16x4xf32>, vector<16x4xf32>, vector<16x4xf32> -> vector<16x32xf32>
    %15 = tpu.concatenate %0, %5, %14 in 1 : vector<16x32xf32>, vector<16x32xf32>, vector<16x32xf32> -> vector<16x96xf32>
    %c0_1 = arith.constant 0 : index
    %c0_2 = arith.constant 0 : index
    %16 = vector.load %arg2[%c0_1, %c0_2] : memref<16x96xf32, #tpu.memory_space<vmem>>, vector<16x96xf32>
    tpu.vector_store %arg2[%c0_1, %c0_2], %15 {strides = array<i32>} : memref<16x96xf32, #tpu.memory_space<vmem>>, vector<16x96xf32>,
    return
  }
  func.func @transform_0(%arg0: i32) -> (i32, i32) {
    %c0_i32 = arith.constant 0 : i32
    %c0_i32_0 = arith.constant 0 : i32
    return %arg0, %c0_i32 : i32, i32
  }
  func.func @transform_1(%arg0: i32) -> (i32, i32) {
    %c0_i32 = arith.constant 0 : i32
    %c0_i32_0 = arith.constant 0 : i32
    return %arg0, %c0_i32 : i32, i32
  }
}

</mosaic_0001>

<bundles_post_ra>
// kernel: tpu_custom_call.1
= control target key start
LH: loop header
LB: loop body
LE: loop exit
PB: predicated region body
PF: predicated region fallthrough
CT: control target
= control target key end

     0   :  { %6 = vsyncpa [#allocation3], 0  ;;  %s274_s0 = inlined_call_operand.hbm [shape: f32[16,32], index: 0, kind: input, shape index: {}]   ;;  %s275_s1 = inlined_call_operand.hbm [shape: f32[16,96], index: 1, kind: output, shape index: {}]  }
   0x1   :  { %7 = vsyncpa [#allocation4], 0  ;;  %s12_s8 = sshll.u32 %s274_s0, 4  ;;  %s199_s9 = smov [#allocation2]   ;;  %s13_s8 = int_to_ptr.hbm [resolvable:$true] %s12_s8 }
   0x2   :  { %s14_s10 = sshll.u32 %s199_s9, 4  ;;  %s200_s11 = smov 128   ;;  %s15_s10 = int_to_ptr.vmem [resolvable:$true] %s14_s10 }
   0x3   :  { %s201_s12 = smov 8  }
   0x4   :  { %20 = dma.hbm_to_vmem [thread:$0]  %s13_s8, 256, %s15_s10, [#allocation3], %s200_s11, %s200_s11, %s201_s12  }
   0x5   :  { %195 = dma.done.wait [#allocation3], 256  }
   0x6   :  { %196 = vsyncadd [#allocation3], 4294967040  ;;  %v226_v0 = vld [vmem:[#allocation2] sm:$0xff]  ;;  %s202_s13 = smov 120   ;;  %s203_s14 = smov 124   ;;  %v231_v1 = vld [vmem:[#allocation2 + $0x8] sm:$0xff] }
   0x7   :  { %29 = vrot.lane.b32.xlu1 %v226_v0, %s202_s13  ;;  %50 = vrot.lane.b32.xlu0 %v226_v0, %s203_s14  ;;  %s204_s0 = smov 116   ;;  %s205_s15 = smov 12   ;;  %vm41_vm0 = vcmask 64512   ;;  %vm44_vm1 = vcmask 130048   ;;  %vm47_vm2 = vcmask 195584   ;;  %vm74_vm3 = vcmask 31744  }
   0x8   :  { %56 = vrot.lane.b32.xlu2 %v226_v0, %s204_s0  ;;  %s206_s16 = smov 4   ;;  %s207_s17 = smov 32   ;;  %vm79_vm4 = vcmask 97280   ;;  %vm84_vm5 = vcmask 162816   ;;  %vm89_vm6 = vcmask 228352   ;;  %vm108_vm7 = vcmask 261120  }
   0x9   :  { %s208_s18 = smov 64   ;;  %vm111_vm8 = vcmask 523264   ;;  %vm114_vm9 = vcmask 785408   ;;  %s209_s19 = smov [#allocation5]  }
   0xa   :  { %s121_s20 = sshll.u32 %s209_s19, 4  ;;  %s123_s23 = sshll.u32 %s275_s1, 4  ;;  %s122_s20 = int_to_ptr.vmem [resolvable:$true] %s121_s20  ;;  %s124_s23 = int_to_ptr.hbm [resolvable:$true] %s123_s23 }
   0xf   :  { %31 = vrot.lane.b32.xlu1 %v231_v1, %s202_s13  ;;  %52 = vrot.lane.b32.xlu0 %v231_v1, %s203_s14 }
  0x10   :  { %58 = vrot.lane.b32.xlu2 %v231_v1, %s204_s0 }
  0x17   :  { %64 = vrot.lane.b32.xlu1 %v231_v1, %s205_s15  ;;  %62 = vrot.lane.b32.xlu0 %v226_v0, %s205_s15 }
  0x18   :  { %35 = vrot.lane.b32.xlu2 %v226_v0, %s201_s12 }
  0x1f   :  { %68 = vrot.lane.b32.xlu1 %v226_v0, %s206_s16  ;;  %37 = vrot.lane.b32.xlu0 %v231_v1, %s201_s12 }
  0x20   :  { %70 = vrot.lane.b32.xlu2 %v231_v1, %s206_s16 }
  0x62   :  { %v57_v2 = vpop.permute.xlu2 %56 }
  0x6a   :  { %v59_v3 = vpop.permute.xlu2 %58 }
  0x72   :  { %v36_v4 = vpop.permute.xlu2 %35 }
  0x79   :  { %v30_v5 = vpop.permute.xlu1 %29  ;;  %v51_v6 = vpop.permute.xlu0 %50 }
  0x7a   :  { %v42_v7 = vsel %vm41_vm0, %v226_v0, %v30_v5  ;;  %v75_v12 = vsel %vm74_vm3, %v226_v0, %v51_v6  ;;  %v71_v21 = vpop.permute.xlu2 %70 }
  0x7b   :  { %v45_v8 = vsel %vm44_vm1, %v42_v7, %v36_v4  ;;  %v77_v15 = vsel %vm41_vm0, %v75_v12, %v30_v5 }
  0x7c   :  { %v48_v9 = vsel %vm47_vm2, %v45_v8, %v226_v0  ;;  %v80_v18 = vsel %vm79_vm4, %v77_v15, %v57_v2 }
  0x7d   :  { %94 = vrot.lane.b32.xlu0 %v48_v9, %s207_s17 }
  0x81   :  { %v32_v10 = vpop.permute.xlu1 %31  ;;  %v53_v11 = vpop.permute.xlu0 %52 }
  0x82   :  { %v76_v16 = vsel %vm74_vm3, %v231_v1, %v53_v11  ;;  %v43_v22 = vsel %vm41_vm0, %v231_v1, %v32_v10 }
  0x83   :  { %v78_v17 = vsel %vm41_vm0, %v76_v16, %v32_v10 }
  0x84   :  { %v81_v20 = vsel %vm79_vm4, %v78_v17, %v59_v3 }
  0x89   :  { %v65_v13 = vpop.permute.xlu1 %64  ;;  %v63_v14 = vpop.permute.xlu0 %62 }
  0x8a   :  { %v82_v19 = vsel %vm44_vm1, %v80_v18, %v63_v14  ;;  %v83_v23 = vsel %vm44_vm1, %v81_v20, %v65_v13 }
  0x8b   :  { %v85_v25 = vsel %vm84_vm5, %v82_v19, %v36_v4 }
  0x91   :  { %v69_v24 = vpop.permute.xlu1 %68  ;;  %v38_v26 = vpop.permute.xlu0 %37 }
  0x92   :  { %v87_v27 = vsel %vm47_vm2, %v85_v25, %v69_v24  ;;  %v46_v28 = vsel %vm44_vm1, %v43_v22, %v38_v26  ;;  %v86_v29 = vsel %vm84_vm5, %v83_v23, %v38_v26 }
  0x93   :  { %v88_v30 = vsel %vm47_vm2, %v86_v29, %v71_v21  ;;  %v90_v31 = vsel %vm89_vm6, %v87_v27, %v226_v0  ;;  %v49_v32 = vsel %vm47_vm2, %v46_v28, %v231_v1 }
  0x94   :  { %102 = vrot.lane.b32.xlu2 %v90_v31, %s208_s18  ;;  %96 = vrot.lane.b32.xlu1 %v49_v32, %s207_s17  ;;  %v91_v33 = vsel %vm89_vm6, %v88_v30, %v231_v1 }
  0x95   :  { %104 = vrot.lane.b32.xlu0 %v91_v33, %s208_s18 }
  0xee   :  { %v103_v35 = vpop.permute.xlu2 %102 }
  0xef   :  { %v95_v34 = vpop.permute.xlu0 %94 }
  0xf0   :  { %v109_v36 = vsel %vm108_vm7, %v226_v0, %v95_v34 }
  0xf1   :  { %v112_v37 = vsel %vm111_vm8, %v109_v36, %v103_v35 }
  0xf2   :  { %115 = vst.msk [vmem:[#allocation5] sm:$0xff] %vm114_vm9, %v112_v37 }
 0x106   :  { %v97_v38 = vpop.permute.xlu1 %96 }
 0x107   :  { %v110_v39 = vsel %vm108_vm7, %v231_v1, %v97_v38  ;;  %v105_v40 = vpop.permute.xlu0 %104 }
 0x108   :  { %v113_v41 = vsel %vm111_vm8, %v110_v39, %v105_v40 }
 0x109   :  { %116 = vst.msk [vmem:[#allocation5 + $0x8] sm:$0xff] %vm114_vm9, %v113_v41 }
 0x10a   :  { %129 = dma.vmem_to_hbm [thread:$0]  %s122_s20, 256, %s124_s23, [#allocation4], %s200_s11, %s200_s11, %s201_s12  }
 0x10b   :  { %197 = dma.done.wait [#allocation4], 256  }
 0x10c   :  { %198 = vsyncadd [#allocation4], 4294967040 }
 0x10d   :  { %134 = vsyncpa [#allocation3], 1 }
 0x10e   :  { %135 = vsyncpa [#allocation4], 1 }

</bundles_post_ra>
